<compile_context>
chip_gen: v5e
topology: v5e:2x2
jax: 0.10.0
libtpu: 0.0.40
codegen_flags: <defaults>
</compile_context>

<pallas_src>
import jax
import jax.numpy as jnp
from jax import lax
from jax.experimental import pallas as pl
from jax.experimental.pallas import tpu as pltpu


# --------------------------------------------------------------------------
# Stage 1: fused Q/K/V projection (hoisted out of the flash kv loop).
# --------------------------------------------------------------------------
def _qkv_proj_kernel(x_ref, wq_ref, wk_ref, wv_ref, q_ref, k_ref, v_ref):
    bb, tm, E = x_ref.shape
    H = wq_ref.shape[1]
    scale = H ** -0.5                      # static Python float (trace time)

    x = x_ref[...].reshape(bb * tm, E)
    # Separate dots (not a fused (E,3H) weight) so no lane-dim slice crosses a
    # 128-wide vreg boundary when H % 128 != 0.
    q = jnp.dot(x, wq_ref[...], preferred_element_type=jnp.float32) * scale
    k = jnp.dot(x, wk_ref[...], preferred_element_type=jnp.float32)
    v = jnp.dot(x, wv_ref[...], preferred_element_type=jnp.float32)

    # Cast back to input dtype so downstream attention matmuls feed the MXU
    # with input-dtype (e.g. bf16) operands.
    q_ref[...] = q.reshape(bb, tm, H).astype(q_ref.dtype)
    k_ref[...] = k.reshape(bb, tm, H).astype(k_ref.dtype)
    v_ref[...] = v.reshape(bb, tm, H).astype(v_ref.dtype)


# --------------------------------------------------------------------------
# Stage 2: flash attention (online softmax) + output projection.
# --------------------------------------------------------------------------
def _flash_attn_kernel(q_ref, k_ref, v_ref, wo_ref, bo_ref, o_ref,
                       m_scratch, l_scratch, acc_scratch):
    qi = pl.program_id(1)
    ki = pl.program_id(2)

    bb, tq, H = q_ref.shape
    _, tk, _ = k_ref.shape
    E = wo_ref.shape[1]

    # ---- init per (batch-block, query-tile)
    @pl.when(ki == 0)
    def _init():
        m_scratch[...] = jnp.full_like(m_scratch, -jnp.inf)
        l_scratch[...] = jnp.zeros_like(l_scratch)
        acc_scratch[...] = jnp.zeros_like(acc_scratch)

    compute_this = ki * tk < (qi + 1) * tq            # tile intersects causal region
    needs_mask = (ki + 1) * tk - 1 > qi * tq          # tile straddles the diagonal

    def _attend(masked):
        q = q_ref[...]                                # x.dtype operands, f32 acc
        k = k_ref[...]
        v = v_ref[...]
        # Scores: contract on H directly (no K transpose / XLU vxpose).
        s = lax.dot_general(q, k,
                            dimension_numbers=(((2,), (2,)), ((0,), (0,))),
                            preferred_element_type=jnp.float32)   # (bb,tq,tk)
        if masked:
            row = qi * tq + lax.broadcasted_iota(jnp.int32, (tq, tk), 0)
            col = ki * tk + lax.broadcasted_iota(jnp.int32, (tq, tk), 1)
            s = jnp.where((col <= row)[None, :, :], s, -jnp.inf)

        # Online softmax update (m/l/acc kept in f32).
        m_prev = m_scratch[...]
        m_new = jnp.maximum(m_prev, jnp.max(s, axis=-1, keepdims=True))
        alpha = jnp.exp(m_prev - m_new)
        p = jnp.exp(s - m_new)
        l_scratch[...] = alpha * l_scratch[...] + jnp.sum(p, axis=-1,
                                                          keepdims=True)
        pv = lax.dot_general(p.astype(v.dtype), v,
                             dimension_numbers=(((2,), (1,)), ((0,), (0,))),
                             preferred_element_type=jnp.float32)  # (bb,tq,H)
        acc_scratch[...] = alpha * acc_scratch[...] + pv
        m_scratch[...] = m_new

    # Masked path only for diagonal-straddling tiles; unmasked fast path else.
    @pl.when(jnp.logical_and(compute_this, needs_mask))
    def _masked():
        _attend(True)

    @pl.when(jnp.logical_and(compute_this, jnp.logical_not(needs_mask)))
    def _unmasked():
        _attend(False)

    # ---- finalize at the last kv tile this query tile actually needs
    last_needed = ((qi + 1) * tq - 1) // tk
    @pl.when(ki == last_needed)
    def _finalize():
        # Exact normalization (runs once per (b, qi) tile; approx not worth it).
        attn = acc_scratch[...] / l_scratch[...]
        out = jnp.dot(attn.reshape(bb * tq, H).astype(wo_ref.dtype),
                      wo_ref[...], preferred_element_type=jnp.float32)
        out = out + bo_ref[...].astype(jnp.float32)
        o_ref[...] = out.reshape(bb, tq, E).astype(o_ref.dtype)


# --------------------------------------------------------------------------
# Tiling / VMEM helpers.
# --------------------------------------------------------------------------
def _vmem_capacity_bytes():
    try:
        return int(pltpu.get_tpu_info().vmem_capacity_bytes)
    except Exception:
        return 64 * 1024 * 1024            # conservative (v7x per-TC)


def _largest_divisor_leq(n, cap):
    for d in range(max(min(n, cap), 1), 0, -1):
        if n % d == 0:
            return d
    return 1


def _pick_seq_tile(T, target, multiple):
    """Largest t <= target dividing T with t % multiple == 0; falls back to
    multiples of 8, then full T (only for awkward T with no aligned divisor)."""
    if T <= target:
        return T
    for m in (multiple, 8):
        t = (target // m) * m
        while t >= m:
            if T % t == 0:
                return t
            t -= m
    return T


def _flash_vmem_bytes(bb, tq, tk, E, H, itemsize):
    io = 2 * (bb * tq * H + 2 * bb * tk * H + bb * tq * E) * itemsize  # dbl-buffered q,k,v,out
    weights = (H * E + E) * itemsize
    scratch = (2 * bb * tq + bb * tq * H) * 4
    live = 2 * bb * tq * tk * 4                                        # s and p slabs (f32)
    return io + weights + scratch + live


def _choose_tiles(B, T, E, H, itemsize, budget, block_q, block_k, block_b):
    bb_cap = max(1, min(block_b, B))
    if B >= 2:
        # Keep >= 2 batch blocks so both TensorCores get work on v7x megacore.
        bb_cap = max(1, min(bb_cap, B // 2))
    bb = _largest_divisor_leq(B, bb_cap)
    tq_t, tk_t = block_q, block_k
    while True:
        tq = _pick_seq_tile(T, tq_t, 16)    # sublane alignment (bf16-friendly)
        tk = _pick_seq_tile(T, tk_t, 128)   # lane dim of the (tq,tk) scores
        if _flash_vmem_bytes(bb, tq, tk, E, H, itemsize) <= budget:
            return bb, tq, tk
        if tk_t > 128 and tk > 128:
            tk_t //= 2
            continue
        if tq_t > 128 and tq > 128:
            tq_t //= 2
            continue
        if bb > 1:
            bb = _largest_divisor_leq(B, max(1, bb // 2))
            continue
        return bb, tq, tk                   # best effort


# --------------------------------------------------------------------------
# Wrapper.
# --------------------------------------------------------------------------
def self_attention(x, wk, wq, wv, wo, bo, *,
                   block_q=None, block_k=None, block_b=None):
    """x: (B, T, E); wk/wq/wv: (E, H) (pre-transposed); wo: (H, E); bo: (E,)."""
    B, T, E = x.shape
    H = wk.shape[1]
    itemsize = x.dtype.itemsize

    # Generation-aware VMEM budgeting (v5e/v6e: 128 MiB; v7x: 64 MiB per TC).
    cap = _vmem_capacity_bytes()
    big_vmem = cap >= 96 * 1024 * 1024
    if block_q is None:
        block_q = 512 if big_vmem else 256
    if block_k is None:
        block_k = 512 if big_vmem else 256
    if block_b is None:
        block_b = 4 if big_vmem else 2
    vmem_limit = int(min(cap * 3 // 4, 96 * 1024 * 1024))

    bb, tq, tk = _choose_tiles(B, T, E, H, itemsize,
                               int(vmem_limit * 0.7),
                               block_q, block_k, block_b)

    # ---- stage 1: Q/K/V projection (one pass over x, Q pre-scaled) ----
    tm = tq
    q, k, v = pl.pallas_call(
        _qkv_proj_kernel,
        out_shape=(jax.ShapeDtypeStruct((B, T, H), x.dtype),
                   jax.ShapeDtypeStruct((B, T, H), x.dtype),
                   jax.ShapeDtypeStruct((B, T, H), x.dtype)),
        grid_spec=pltpu.PrefetchScalarGridSpec(
            num_scalar_prefetch=0,
            grid=(B // bb, T // tm),
            in_specs=[
                pl.BlockSpec((bb, tm, E), lambda b, i: (b, i, 0)),   # x
                pl.BlockSpec((E, H), lambda b, i: (0, 0)),           # Wq
                pl.BlockSpec((E, H), lambda b, i: (0, 0)),           # Wk
                pl.BlockSpec((E, H), lambda b, i: (0, 0)),           # Wv
            ],
            out_specs=[
                pl.BlockSpec((bb, tm, H), lambda b, i: (b, i, 0)),
                pl.BlockSpec((bb, tm, H), lambda b, i: (b, i, 0)),
                pl.BlockSpec((bb, tm, H), lambda b, i: (b, i, 0)),
            ],
        ),
        compiler_params=pltpu.CompilerParams(
            dimension_semantics=("parallel", "parallel"),
            vmem_limit_bytes=vmem_limit,
        ),
    )(x, wq, wk, wv)

    # ---- stage 2: flash attention + output projection ----
    bo2 = bo.reshape(1, E)
    n_k = T // tk

    def kv_index_map(b, qi, ki):
        # Clamp so causally-skipped KV tiles reuse the previous block index
        # (Pallas elides the DMA for those grid steps).
        return (b, jnp.minimum(ki, ((qi + 1) * tq - 1) // tk), 0)

    return pl.pallas_call(
        _flash_attn_kernel,
        out_shape=jax.ShapeDtypeStruct((B, T, E), x.dtype),
        grid_spec=pltpu.PrefetchScalarGridSpec(
            num_scalar_prefetch=0,
            grid=(B // bb, T // tq, n_k),
            in_specs=[
                pl.BlockSpec((bb, tq, H), lambda b, qi, ki: (b, qi, 0)),  # Q tile
                pl.BlockSpec((bb, tk, H), kv_index_map),                  # K tile
                pl.BlockSpec((bb, tk, H), kv_index_map),                  # V tile
                pl.BlockSpec((H, E), lambda b, qi, ki: (0, 0)),           # Wo
                pl.BlockSpec((1, E), lambda b, qi, ki: (0, 0)),           # bo
            ],
            out_specs=pl.BlockSpec((bb, tq, E), lambda b, qi, ki: (b, qi, 0)),
            scratch_shapes=[
                pltpu.VMEM((bb, tq, 1), jnp.float32),   # running max m
                pltpu.VMEM((bb, tq, 1), jnp.float32),   # running sum l
                pltpu.VMEM((bb, tq, H), jnp.float32),   # output accumulator
            ],
        ),
        compiler_params=pltpu.CompilerParams(
            dimension_semantics=("parallel", "parallel", "arbitrary"),
            vmem_limit_bytes=vmem_limit,
        ),
    )(q, k, v, wo, bo2)


def _reference(x, wk, wq, wv, wo, bo):
    """Pure-JAX reference mirroring the PyTorch forward."""
    k = x @ wk
    q = x @ wq
    v = x @ wv
    T = x.shape[1]
    H = wk.shape[1]
    wei = (q @ jnp.swapaxes(k, -2, -1)) * (H ** -0.5)
    tril = jnp.tril(jnp.ones((T, T), dtype=bool))
    wei = jnp.where(tril, wei, -jnp.inf)
    wei = jax.nn.softmax(wei, axis=-1)
    out = wei @ v
    return out @ wo + bo


if __name__ == "__main__":
    # Small shapes consistent with the module: batch=2, seq=8, embed=32, head=16.
    B, T, E, H = 2, 8, 32, 16

    key = jax.random.PRNGKey(0)
    kx, kk, kq, kv, kwo, kbo = jax.random.split(key, 6)

    x = jax.random.normal(kx, (B, T, E), dtype=jnp.float32)

    # Deterministic init mimicking PyTorch Linear's U(-1/sqrt(in), 1/sqrt(in)).
    lim_e = 1.0 / (E ** 0.5)
    lim_h = 1.0 / (H ** 0.5)
    wk = jax.random.uniform(kk, (E, H), jnp.float32, -lim_e, lim_e)
    wq = jax.random.uniform(kq, (E, H), jnp.float32, -lim_e, lim_e)
    wv = jax.random.uniform(kv, (E, H), jnp.float32, -lim_e, lim_e)
    wo = jax.random.uniform(kwo, (H, E), jnp.float32, -lim_h, lim_h)
    bo = jax.random.uniform(kbo, (E,), jnp.float32, -lim_h, lim_h)

    out = jax.block_until_ready(self_attention(x, wk, wq, wv, wo, bo))
    ref = _reference(x, wk, wq, wv, wo, bo)

    assert out.shape == (B, T, E)
    # Tight tolerance: exact division in finalize, f32 accumulation throughout.
    assert jnp.allclose(out, ref, atol=2e-4, rtol=2e-4), \
        float(jnp.max(jnp.abs(out - ref)))

    print("KERNEL_OK")
</pallas_src>

<mosaic_0001>
module attributes {stable_mosaic.version = 11 : i64} {
  func.func @_qkv_proj_kernel(%arg0: i32, %arg1: i32, %arg2: memref<1x8x32xf32, #tpu.memory_space<vmem>>, %arg3: memref<32x16xf32, #tpu.memory_space<vmem>>, %arg4: memref<32x16xf32, #tpu.memory_space<vmem>>, %arg5: memref<32x16xf32, #tpu.memory_space<vmem>>, %arg6: memref<1x8x16xf32, #tpu.memory_space<vmem>>, %arg7: memref<1x8x16xf32, #tpu.memory_space<vmem>>, %arg8: memref<1x8x16xf32, #tpu.memory_space<vmem>>) attributes {dimension_semantics = [#tpu.dimension_semantics<parallel>, #tpu.dimension_semantics<parallel>], iteration_bounds = array<i64: 2, 1>, scalar_prefetch = 0 : i64, scratch_operands = 0 : i64, tpu.core_type = #tpu.core_type<tc>, window_params = [{transform_indices = @transform_0, window_bounds = array<i64: 1, 8, 32>}, {pipeline_mode = #tpu.pipeline_mode<synchronous>, transform_indices = @transform_1, window_bounds = array<i64: 32, 16>}, {pipeline_mode = #tpu.pipeline_mode<synchronous>, transform_indices = @transform_2, window_bounds = array<i64: 32, 16>}, {pipeline_mode = #tpu.pipeline_mode<synchronous>, transform_indices = @transform_3, window_bounds = array<i64: 32, 16>}, {transform_indices = @transform_4, window_bounds = array<i64: 1, 8, 16>}, {transform_indices = @transform_5, window_bounds = array<i64: 1, 8, 16>}, {transform_indices = @transform_6, window_bounds = array<i64: 1, 8, 16>}]} {
    %c0 = arith.constant 0 : index
    %c0_0 = arith.constant 0 : index
    %c0_1 = arith.constant 0 : index
    %0 = vector.load %arg2[%c0, %c0_0, %c0_1] : memref<1x8x32xf32, #tpu.memory_space<vmem>>, vector<1x8x32xf32>
    %1 = vector.shape_cast %0 : vector<1x8x32xf32> to vector<8x32xf32>
    %c0_2 = arith.constant 0 : index
    %c0_3 = arith.constant 0 : index
    %2 = vector.load %arg3[%c0_2, %c0_3] : memref<32x16xf32, #tpu.memory_space<vmem>>, vector<32x16xf32>
    %cst = arith.constant dense<0.000000e+00> : vector<8x16xf32>
    %3 = tpu.matmul %1, %2, %cst {dimension_numbers = #tpu.dot_dimension_numbers<[1], [0], [0], [1], [0, 0, 1, 1], [], []>} : vector<8x32xf32>, vector<32x16xf32>, vector<8x16xf32> -> vector<8x16xf32>
    %cst_4 = arith.constant 2.500000e-01 : f32
    %4 = vector.broadcast %cst_4 : f32 to vector<8x16xf32>
    %5 = arith.mulf %3, %4 : vector<8x16xf32>
    %c0_5 = arith.constant 0 : index
    %c0_6 = arith.constant 0 : index
    %6 = vector.load %arg4[%c0_5, %c0_6] : memref<32x16xf32, #tpu.memory_space<vmem>>, vector<32x16xf32>
    %cst_7 = arith.constant dense<0.000000e+00> : vector<8x16xf32>
    %7 = tpu.matmul %1, %6, %cst_7 {dimension_numbers = #tpu.dot_dimension_numbers<[1], [0], [0], [1], [0, 0, 1, 1], [], []>} : vector<8x32xf32>, vector<32x16xf32>, vector<8x16xf32> -> vector<8x16xf32>
    %c0_8 = arith.constant 0 : index
    %c0_9 = arith.constant 0 : index
    %8 = vector.load %arg5[%c0_8, %c0_9] : memref<32x16xf32, #tpu.memory_space<vmem>>, vector<32x16xf32>
    %cst_10 = arith.constant dense<0.000000e+00> : vector<8x16xf32>
    %9 = tpu.matmul %1, %8, %cst_10 {dimension_numbers = #tpu.dot_dimension_numbers<[1], [0], [0], [1], [0, 0, 1, 1], [], []>} : vector<8x32xf32>, vector<32x16xf32>, vector<8x16xf32> -> vector<8x16xf32>
    %10 = vector.shape_cast %5 : vector<8x16xf32> to vector<1x8x16xf32>
    %c0_11 = arith.constant 0 : index
    %c0_12 = arith.constant 0 : index
    %c0_13 = arith.constant 0 : index
    %11 = vector.load %arg6[%c0_11, %c0_12, %c0_13] : memref<1x8x16xf32, #tpu.memory_space<vmem>>, vector<1x8x16xf32>
    tpu.vector_store %arg6[%c0_11, %c0_12, %c0_13], %10 {strides = array<i32>} : memref<1x8x16xf32, #tpu.memory_space<vmem>>, vector<1x8x16xf32>,
    %12 = vector.shape_cast %7 : vector<8x16xf32> to vector<1x8x16xf32>
    %c0_14 = arith.constant 0 : index
    %c0_15 = arith.constant 0 : index
    %c0_16 = arith.constant 0 : index
    %13 = vector.load %arg7[%c0_14, %c0_15, %c0_16] : memref<1x8x16xf32, #tpu.memory_space<vmem>>, vector<1x8x16xf32>
    tpu.vector_store %arg7[%c0_14, %c0_15, %c0_16], %12 {strides = array<i32>} : memref<1x8x16xf32, #tpu.memory_space<vmem>>, vector<1x8x16xf32>,
    %14 = vector.shape_cast %9 : vector<8x16xf32> to vector<1x8x16xf32>
    %c0_17 = arith.constant 0 : index
    %c0_18 = arith.constant 0 : index
    %c0_19 = arith.constant 0 : index
    %15 = vector.load %arg8[%c0_17, %c0_18, %c0_19] : memref<1x8x16xf32, #tpu.memory_space<vmem>>, vector<1x8x16xf32>
    tpu.vector_store %arg8[%c0_17, %c0_18, %c0_19], %14 {strides = array<i32>} : memref<1x8x16xf32, #tpu.memory_space<vmem>>, vector<1x8x16xf32>,
    return
  }
  func.func @transform_0(%arg0: i32, %arg1: i32) -> (i32, i32, i32) {
    %c0_i32 = arith.constant 0 : i32
    %c0_i32_0 = arith.constant 0 : i32
    return %arg0, %arg1, %c0_i32 : i32, i32, i32
  }
  func.func @transform_1(%arg0: i32, %arg1: i32) -> (i32, i32) {
    %c0_i32 = arith.constant 0 : i32
    %c0_i32_0 = arith.constant 0 : i32
    %c0_i32_1 = arith.constant 0 : i32
    return %c0_i32, %c0_i32_0 : i32, i32
  }
  func.func @transform_2(%arg0: i32, %arg1: i32) -> (i32, i32) {
    %c0_i32 = arith.constant 0 : i32
    %c0_i32_0 = arith.constant 0 : i32
    %c0_i32_1 = arith.constant 0 : i32
    return %c0_i32, %c0_i32_0 : i32, i32
  }
  func.func @transform_3(%arg0: i32, %arg1: i32) -> (i32, i32) {
    %c0_i32 = arith.constant 0 : i32
    %c0_i32_0 = arith.constant 0 : i32
    %c0_i32_1 = arith.constant 0 : i32
    return %c0_i32, %c0_i32_0 : i32, i32
  }
  func.func @transform_4(%arg0: i32, %arg1: i32) -> (i32, i32, i32) {
    %c0_i32 = arith.constant 0 : i32
    %c0_i32_0 = arith.constant 0 : i32
    return %arg0, %arg1, %c0_i32 : i32, i32, i32
  }
  func.func @transform_5(%arg0: i32, %arg1: i32) -> (i32, i32, i32) {
    %c0_i32 = arith.constant 0 : i32
    %c0_i32_0 = arith.constant 0 : i32
    return %arg0, %arg1, %c0_i32 : i32, i32, i32
  }
  func.func @transform_6(%arg0: i32, %arg1: i32) -> (i32, i32, i32) {
    %c0_i32 = arith.constant 0 : i32
    %c0_i32_0 = arith.constant 0 : i32
    return %arg0, %arg1, %c0_i32 : i32, i32, i32
  }
}

</mosaic_0001>

<bundles_post_ra>
// kernel: tpu_custom_call.1
= control target key start
LH: loop header
LB: loop body
LE: loop exit
PB: predicated region body
PF: predicated region fallthrough
CT: control target
= control target key end

     0   :  { %s1053_s0 = inlined_call_operand.vmem [shape: f32[2,8,32], index: 0, kind: input, shape index: {}]   ;;  %s1054_s1 = inlined_call_operand.vmem [shape: f32[32,16], index: 1, kind: input, shape index: {}]   ;;  %s1055_s2 = inlined_call_operand.vmem [shape: f32[32,16], index: 2, kind: input, shape index: {}]   ;;  %s1056_s3 = inlined_call_operand.vmem [shape: f32[32,16], index: 3, kind: input, shape index: {}]   ;;  %s1057_s4 = inlined_call_operand.hbm [shape: f32[2,8,16], index: 4, kind: output, shape index: {0}]   ;;  %s1058_s5 = inlined_call_operand.hbm [shape: f32[2,8,16], index: 5, kind: output, shape index: {1}]   ;;  %s1059_s6 = inlined_call_operand.hbm [shape: f32[2,8,16], index: 6, kind: output, shape index: {2}]  }
   0x1   :  { %1067 = sst [smem:[#allocation11_spill]] %s1053_s0 }
   0x2   :  { %1068 = sst [smem:[#allocation12_spill]] %s1054_s1 }
   0x3   :  { %12 = vsyncpa [#allocation3], 0 }
   0x4   :  { %14 = vsyncpa [#allocation3 + $0x1], 0 }
   0x5   :  { %15 = vsyncpa [#allocation5], 0 }
   0x6   :  { %17 = vsyncpa [#allocation5 + $0x1], 0  ;;  %s829_s21 = smov 0   ;;  %s831_s22 = smov 0  }
   0x7   :  { %s833_s23 = smov 0   ;;  %s835_s24 = smov 0  }
   0x8   :  { %s837_s25 = smov 0   ;;  %s839_s26 = smov 0  }
   0x9 LB: > { %s569_s27 = sadd.s32 4294967295, %s792_s26   ;;  %s1060_s28 = sadd.s32 4294967294, %s792_s26   ;;  %s792_s26 = sphi %s839_s26, %s23_s26   ;;  %s788_s25 = sphi %s837_s25, %s1088_s25   ;;  %s784_s24 = sphi %s835_s24, %s1087_s24   ;;  %s780_s23 = sphi %s833_s23, %s1086_s23   ;;  %s776_s22 = sphi %s831_s22, %s1085_s22   ;;  %s772_s21 = sphi %s829_s21, %s1084_s21  }
   0xa   : > { %s35_s29 = sadd.s32 1, %s788_s25  ;;  %s135_s30 = sadd.s32 1, %s780_s23 }
   0xb   : > { %p37_p0 = scmp.ge.s32.totalorder %s35_s29, 2  ;;  %p145_p1 = scmp.ne.s32.totalorder %s780_s23, %s776_s22 }
   0xc   : > { %p146_p2 = scmp.eq.s32.totalorder %s569_s27, 1  ;;  %p151_p3 = scmp.ne.s32.totalorder %s776_s22, %s772_s21 }
   0xd   : > { %s1090_s29 = smov (%p37_p0, %s35_s29), 0  ;;  %p152_p5 = scmp.eq.s32.totalorder %s1060_s28, 1 }
   0xe   : > { %p871_p4 = por %p146_p2, %p145_p1  ;;  %s130_s8 = ssub.s32 %s788_s25, %s1090_s29 }
   0xf   : > { %p573_p6 = scmp.ge.s32.totalorder %s792_s26, 1  ;;  %p133_p7 = scmp.eq.s32.totalorder %s130_s8, 0 }
  0x10   : > { %p880_p8 = por %p152_p5, %p151_p3  ;;  %p245_p9 = scmp.lt.s32.totalorder %s792_s26, 3 }
  0x11   : > { %s886_s10 = scalar_select %p133_p7, %s780_s23, %s135_s30  }
  0x12   : > { %p246_p10 = pnand %p573_p6, %p245_p9 }
  0x14   : > { %249 = sbr.rel (%p246_p10) target bundleno = 206 (0xce), region = 36 }
  0x19   : > { %v351_v0 = vld [vmem:[%s1056_s3 + $0x18] sm:$0xff]  ;;  %v350_v1 = vld [vmem:[%s1056_s3 + $0x10] sm:$0xff]  ;;  %s1071_s1 = sld [smem:[#allocation12_spill]]  ;;  %p287_p11 = scmp.lt.s32.totalorder %s784_s24, 1  ;;  %v349_v5 = vld [vmem:[%s1056_s3 + $0x8] sm:$0xff]  ;;  %vm299_vm0 = vcmask 261120  }
  0x1a   : > { %364 = vmatpush.msra.mxu2 %v351_v0  ;;  %v327_v3 = vld [vmem:[%s1055_s2 + $0x18] sm:$0xff]  ;;  %v326_v6 = vld [vmem:[%s1055_s2 + $0x10] sm:$0xff]  ;;  %v325_v8 = vld [vmem:[%s1055_s2 + $0x8] sm:$0xff]  ;;  %s1072_s0 = sld [smem:[#allocation11_spill]]  ;;  %s584_s18 = sshll.u32 %s784_s24, 3  ;;  %vm372_vm1 = vcmask 130048  }
  0x1b   : > { %340 = vmatpush.msra.mxu1 %v327_v3  ;;  %s288_s13 = scalar_select %p287_p11, %s784_s24, 1  ;;  %v348_v9 = vld [vmem:[%s1056_s3] sm:$0xff] }
  0x1c   : > { %365 = vmatpush.msra.mxu2 %v350_v1  ;;  %v324_v12 = vld [vmem:[%s1055_s2] sm:$0xff]  ;;  %s937_s19 = sand.u32 1, %s569_s27   ;;  %s413_s12 = scalar_lea.hbm %s1058_s5, %s584_s18 }
  0x1d   : > { %341 = vmatpush.msra.mxu1 %v326_v6  ;;  %s577_s20 = sshll.u32 %s288_s13, 3  ;;  %s1061_s13 = sand.u32 1, %s776_s22  }
  0x1e   : > { %366 = vmatpush.msra.mxu2 %v349_v5  ;;  %s932_s17 = sshll.u32 %s1061_s13, 3  ;;  %s398_s16 = scalar_lea.hbm %s1057_s4, %s584_s18 }
  0x1f   : > { %v298_v2 = vld [vmem:[%s1071_s1 + $0x18] sm:$0xff]  ;;  %v297_v4 = vld [vmem:[%s1071_s1 + $0x10] sm:$0xff]  ;;  %v296_v7 = vld [vmem:[%s1071_s1 + $0x8] sm:$0xff]  ;;  %342 = vmatpush.msra.mxu1 %v325_v8  ;;  %s279_s28 = scalar_lea.vmem [#allocation4], %s932_s17  ;;  %s428_s27 = scalar_lea.hbm %s1059_s6, %s584_s18 }
  0x20   : > { %315 = vmatpush.msra.mxu0 %v298_v2  ;;  %v295_v10 = vld [vmem:[%s1071_s1] sm:$0xff]  ;;  %s293_s14 = scalar_lea.vmem %s1072_s0, %s577_s20  ;;  %367 = vmatpush.msra.mxu2 %v348_v9  ;;  %s1062_s20 = scalar_lea.vmem [#allocation6], %s932_s17 }
  0x21   : > { %v294_v11 = vld [vmem:[%s293_s14] sm:$0xff]  ;;  %343 = vmatpush.msra.mxu1 %v324_v12  ;;  %s942_s30 = sshll.u32 %s1062_s20, 4  ;;  %s951_s13 = sshll.u32 %s279_s28, 4  ;;  %s416_s13 = int_to_ptr.vmem [resolvable:$true] %s951_s13 }
  0x22   : > { %316 = vmatpush.msra.mxu0 %v297_v4  ;;  %580 = vmatmul.msk.f32.vlgmr.msra.gmra.mxu2 %vm299_vm0, %v294_v11  ;;  %1073 = sst [smem:[#allocation9_spill]] %s942_s30  ;;  %s956_s1 = sshll.u32 %s413_s12, 4  ;;  %s418_s1 = int_to_ptr.hbm [resolvable:$true] %s956_s1 }
  0x23   : > { %579 = vmatmul.msk.f32.vlgmr.msra.gmra.mxu1 %vm299_vm0, %v294_v11  ;;  %s1063_s20 = scalar_lea.vmem [#allocation2], %s932_s17  ;;  %s963_s11 = sshll.u32 %s398_s16, 4  ;;  %s403_s11 = int_to_ptr.hbm [resolvable:$true] %s963_s11 }
  0x24   : > { %317 = vmatpush.msra.mxu0 %v296_v7  ;;  %s961_s8 = sshll.u32 %s1063_s20, 4  ;;  %s966_s0 = sshll.u32 %s428_s27, 4  ;;  %s401_s8 = int_to_ptr.vmem [resolvable:$true] %s961_s8 }
  0x25   : > { %1074 = sst [smem:[#allocation10_spill]] %s966_s0  ;;  %s382_s18 = scalar_lea.sflag [#allocation5], %s937_s19 }
  0x26   : > { %318 = vmatpush.msra.mxu0 %v295_v10  ;;  %s668_s12 = sshra.s32 %s418_s1, 4  ;;  %s674_s24 = scalar_lea.hbm %s1058_s5, 16  ;;  %s669_s12 = int_to_ptr.hbm [resolvable:$true] %s668_s12 }
  0x27   : > { %578 = vmatmul.msk.f32.vlgmr.msra.gmra.mxu0 %vm299_vm0, %v294_v11  ;;  %s670_s14 = scalar_lea.hbm %s669_s12, 8  ;;  %p675_p1 = scmp.lt.s32.totalorder %s669_s12, %s1058_s5 }
  0x28   : > { %p671_p12 = scmp.ne.s32.totalorder %s669_s12, %s670_s14  ;;  %p676_p2 = scmp.lt.s32.totalorder %s674_s24, %s670_s14 }
  0x2a   : > { %p672_p13 = pnand %p671_p12, %p871_p4  ;;  %p677_p3 = por %p676_p2, %p675_p1 }
  0x2c   : > { %p673_p0 = pneg %p672_p13 }
  0x2e   : > { %p678_p5 = pnand %p677_p3, %p673_p0 }
  0xa0   : > { %v345_v15 = vpop.f32.mrf.mxu1 }
  0xa1   : > { %374 = vst.msk [vmem:[%s279_s28] sm:$0xff] %vm372_vm1, %v345_v15 }
  0xa4   : > { %v320_v13 = vpop.f32.mrf.mxu0 }
  0xa5   : > { %v323_v14 = vmul.f32 0.25, %v320_v13 }
  0xa6   : > { %681 = shalt.err (!%p678_p5)
}
  0xa7   : > { %590 = dma.vmem_to_hbm [thread:$0]  (%p871_p4), %s416_s13, 128, %s418_s1, %s382_s18  }
  0xa8   : > { %s1075_s28 = scalar_lea.vmem [#allocation2], %s932_s17  ;;  %s1076_s15 = sand.u32 1, %s776_s22  }
  0xa9   : > { %373 = vst.msk [vmem:[%s1075_s28] sm:$0xff] %vm372_vm1, %v323_v14  ;;  %s377_s16 = scalar_lea.sflag [#allocation3], %s1076_s15  ;;  %s696_s20 = sshra.s32 %s403_s11, 4  ;;  %s697_s20 = int_to_ptr.hbm [resolvable:$true] %s696_s20 }
  0xaa   : > { %s698_s12 = scalar_lea.hbm %s697_s20, 8  ;;  %s702_s27 = scalar_lea.hbm %s1057_s4, 16 }
  0xab   : > { %p699_p6 = scmp.ne.s32.totalorder %s697_s20, %s698_s12  ;;  %p703_p10 = scmp.lt.s32.totalorder %s697_s20, %s1057_s4 }
  0xac   : > { %p704_p11 = scmp.lt.s32.totalorder %s702_s27, %s698_s12 }
  0xad   : > { %p700_p7 = pnand %p699_p6, %p871_p4 }
  0xae   : > { %p705_p12 = por %p704_p11, %p703_p10 }
  0xaf   : > { %p701_p9 = pneg %p700_p7 }
  0xb1   : > { %p706_p13 = pnand %p705_p12, %p701_p9 }
  0xb3   : > { %709 = shalt.err (!%p706_p13)
}
  0xb4   : > { %s1077_s1 = sld [smem:[#allocation10_spill]]  ;;  %v369_v16 = vpop.f32.mrf.mxu2  ;;  %s1078_s13 = scalar_lea.vmem [#allocation6], %s932_s17 }
  0xb5   : > { %589 = dma.vmem_to_hbm [thread:$0]  (%p871_p4), %s401_s8, 128, %s403_s11, %s377_s16   ;;  %375 = vst.msk [vmem:[%s1078_s13] sm:$0xff] %vm372_vm1, %v369_v16 }
  0xb6   : > { %s730_s12 = scalar_lea.hbm %s1059_s6, 16 }
  0xba   : > { %s1079_s30 = int_to_ptr.hbm [resolvable:$true] %s1077_s1 }
  0xbb   : > { %s724_s0 = sshra.s32 %s1079_s30, 4  ;;  %s725_s0 = int_to_ptr.hbm [resolvable:$true] %s724_s0 }
  0xbc   : > { %s726_s28 = scalar_lea.hbm %s725_s0, 8  ;;  %p731_p3 = scmp.lt.s32.totalorder %s725_s0, %s1059_s6 }
  0xbd   : > { %p727_p0 = scmp.ne.s32.totalorder %s725_s0, %s726_s28  ;;  %p732_p5 = scmp.lt.s32.totalorder %s730_s12, %s726_s28 }
  0xbf   : > { %p728_p1 = pnand %p727_p0, %p871_p4  ;;  %p733_p6 = por %p732_p5, %p731_p3 }
  0xc1   : > { %p729_p2 = pneg %p728_p1 }
  0xc3   : > { %p734_p7 = pnand %p733_p6, %p729_p2 }
  0xc5   : > { %737 = shalt.err (!%p734_p7)
}
  0xc6   : > { %s1080_s17 = smov %s1079_s30  ;;  %s1081_s8 = sld [smem:[#allocation9_spill]] }
  0xcc   : > { %s1082_s11 = int_to_ptr.vmem [resolvable:$true] %s1081_s8 }
  0xcd   : > { %591 = dma.vmem_to_hbm [thread:$0]  (%p871_p4), %s1082_s11, 128, %s1080_s17, %s382_s18  }
  0xce PF: > { %p605_p9 = scmp.ge.s32.totalorder %s792_s26, 2  ;;  %s444_s16 = sand.u32 1, %s772_s21  }
  0xcf   : > { %s445_s27 = scalar_lea.sflag [#allocation3], %s444_s16 }
  0xd0   : > { %p596_p10 = pnand %p605_p9, %p880_p8 }
  0xd2   : > { %p597_p11 = pneg %p596_p10 }
  0xd4   : > { %763 = dma.done.wait (%p597_p11), %s445_s27, 128  }
  0xd5   : > { %765 = vsyncadd (%p597_p11), %s445_s27, 4294967168  ;;  %s1083_s7 = sadd.s32 4294967294, %s792_s26  }
  0xd6   : > { %s454_s19 = sand.u32 1, %s1083_s7  }
  0xd7   : > { %s455_s13 = scalar_lea.sflag [#allocation5], %s454_s19 }
  0xd8   : > { %767 = dma.done.wait (%p597_p11), %s455_s13, 256  }
  0xd9   : > { %769 = vsyncadd (%p597_p11), %s455_s13, 4294967040  ;;  %s23_s26 = sadd.s32 1, %s792_s26   ;;  %s1084_s21 = smov %s776_s22 }
  0xda   : > { %p20_p4 = scmp.ge.s32.totalorder %s23_s26, 4   ;;  %s1085_s22 = smov %s780_s23 }
  0xdb   : > { %s1086_s23 = smov %s886_s10  ;;  %s1087_s24 = smov %s788_s25 }
  0xdc   : > { %s1088_s25 = smov %s1090_s29  ;;  %22 = sbr.rel (!%p20_p4) target bundleno = 9 (0x9), region = 103 }
  0xe1   :  { %471 = vsyncpa [#allocation3], 1 }
  0xe2   :  { %473 = vsyncpa [#allocation3 + $0x1], 1 }
  0xe3   :  { %474 = vsyncpa [#allocation5], 1 }
  0xe4   :  { %476 = vsyncpa [#allocation5 + $0x1], 1 }

</bundles_post_ra>
